<compile_context>
chip_gen: v6e
topology: v6e:2x2x1
jax: 0.10.0
libtpu: 0.0.40
codegen_flags: <defaults>
</compile_context>

<pallas_src>
import jax
import jax.numpy as jnp
from jax.experimental import pallas as pl
from jax.experimental.pallas import tpu as pltpu


def _round_up(x, m):
    return ((x + m - 1) // m) * m


def _qnet_kernel(obs_ref, act_ref, w1o_ref, w1a_ref, b1_ref, w2_ref, b2_ref,
                 w3_ref, b3_ref, o_ref):
    # obs:  [TB, obs_dim]   act: [TB, act_dim]    (compute dtype, maybe bf16)
    # w1o:  [obs_dim, H]    w1a: [act_dim, H]     w2: [H, H]  (compute dtype)
    # b1/b2:[1, H] f32      w3:  [1, H] f32       b3: [1, 1] f32
    cdt = w1o_ref.dtype

    # Fused concat: x @ W1 == obs @ W1[:obs_dim] + act @ W1[obs_dim:]
    h1 = (jnp.dot(obs_ref[...].astype(cdt), w1o_ref[...],
                  preferred_element_type=jnp.float32)
          + jnp.dot(act_ref[...].astype(cdt), w1a_ref[...],
                    preferred_element_type=jnp.float32)
          + b1_ref[...])
    h1 = jnp.maximum(h1, 0.0)

    h2 = jnp.dot(h1.astype(cdt), w2_ref[...],
                 preferred_element_type=jnp.float32) + b2_ref[...]
    h2 = jnp.maximum(h2, 0.0)

    # Final [H, 1] layer as a lane reduction (MXU N=1 pass would waste 127/128
    # of the array; the XLU reduce rides a slot the matmuls don't use).
    q = jnp.sum(h2 * w3_ref[...], axis=-1, keepdims=True) + b3_ref[...]
    o_ref[...] = q.astype(o_ref.dtype)


def qnetwork_forward(obs, action, params, *, block_batch=512,
                     compute_dtype=jnp.float32):
    """cat([obs, action], -1) -> Linear -> ReLU -> Linear -> ReLU -> Linear(->1)."""
    w1, b1, w2, b2, w3, b3 = params
    obs_dim = obs.shape[-1]
    act_dim = action.shape[-1]
    hidden = w1.shape[1]
    batch = obs.shape[0]

    # Split W1 so the concat fuses into the first matmul; final layer as a row.
    w1o = w1[:obs_dim].astype(compute_dtype)
    w1a = w1[obs_dim:].astype(compute_dtype)
    w2c = w2.astype(compute_dtype)
    w3r = w3.reshape(1, hidden).astype(jnp.float32)   # [H, 1] -> [1, H]
    b1f = b1.reshape(1, hidden).astype(jnp.float32)
    b2f = b2.reshape(1, hidden).astype(jnp.float32)
    b3f = b3.reshape(1, 1).astype(jnp.float32)

    itemsize = jnp.dtype(compute_dtype).itemsize
    sub = 16 if itemsize < 4 else 8                    # sublane multiple (packed dtypes)
    tb = min(_round_up(block_batch, sub), _round_up(batch, sub))
    b_pad = _round_up(batch, tb)

    obs_c = obs.astype(compute_dtype)
    act_c = action.astype(compute_dtype)
    if b_pad != batch:
        obs_c = jnp.pad(obs_c, ((0, b_pad - batch), (0, 0)))
        act_c = jnp.pad(act_c, ((0, b_pad - batch), (0, 0)))

    grid = (b_pad // tb,)

    # VMEM budget: double-buffered streamed tiles + resident weights + f32
    # intermediates, with 2x headroom; clamped well under v7x's 64 MiB.
    est = (2 * tb * (obs_dim + act_dim) * itemsize                     # obs/act tiles
           + 2 * tb * 4                                                # output tile
           + 2 * ((obs_dim + act_dim) * hidden + hidden * hidden) * itemsize
           + 2 * (3 * hidden + 1) * 4                                  # biases + w3 row
           + 4 * tb * hidden * 4)                                      # h1 / h2
    vmem_limit = int(min(48 * 1024 * 1024, max(32 * 1024 * 1024, 2 * est)))

    const = lambda i: (0, 0)
    out = pl.pallas_call(
        _qnet_kernel,
        out_shape=jax.ShapeDtypeStruct((b_pad, 1), jnp.float32),
        grid=grid,
        in_specs=[
            pl.BlockSpec((tb, obs_dim), lambda i: (i, 0)),   # streamed per tile
            pl.BlockSpec((tb, act_dim), lambda i: (i, 0)),   # streamed per tile
            pl.BlockSpec((obs_dim, hidden), const),          # VMEM-resident weights
            pl.BlockSpec((act_dim, hidden), const),
            pl.BlockSpec((1, hidden), const),
            pl.BlockSpec((hidden, hidden), const),
            pl.BlockSpec((1, hidden), const),
            pl.BlockSpec((1, hidden), const),
            pl.BlockSpec((1, 1), const),
        ],
        out_specs=pl.BlockSpec((tb, 1), lambda i: (i, 0)),
        compiler_params=pltpu.CompilerParams(
            dimension_semantics=("parallel",),   # megacore / dual-TC batch sharding
            vmem_limit_bytes=vmem_limit,
        ),
    )(obs_c, act_c, w1o, w1a, b1f, w2c, b2f, w3r, b3f)

    return out[:batch]


def init_params(key, obs_dim, action_dim, hidden_dim=256):
    """nn.Linear-style init (uniform +-1/sqrt(fan_in)); weights stored [in, out]."""
    in_dim = obs_dim + action_dim
    ks = jax.random.split(key, 6)

    def u(k, shape, fan_in):
        bound = 1.0 / jnp.sqrt(fan_in)
        return jax.random.uniform(k, shape, jnp.float32, -bound, bound)

    w1 = u(ks[0], (in_dim, hidden_dim), in_dim)
    b1 = u(ks[1], (1, hidden_dim), in_dim)
    w2 = u(ks[2], (hidden_dim, hidden_dim), hidden_dim)
    b2 = u(ks[3], (1, hidden_dim), hidden_dim)
    w3 = u(ks[4], (hidden_dim, 1), hidden_dim)
    b3 = u(ks[5], (1, 1), hidden_dim)
    return (w1, b1, w2, b2, w3, b3)


def _reference_forward(obs, action, params):
    w1, b1, w2, b2, w3, b3 = params
    x = jnp.concatenate([obs, action], axis=-1)
    h1 = jnp.maximum(x @ w1 + b1, 0.0)
    h2 = jnp.maximum(h1 @ w2 + b2, 0.0)
    return h2 @ w3 + b3


if __name__ == "__main__":
    key = jax.random.PRNGKey(0)

    # ---- correctness config: small shapes consistent with the module ----
    batch, obs_dim, action_dim, hidden_dim = 8, 12, 4, 32
    k_obs, k_act, k_par, k_rest = jax.random.split(key, 4)
    obs = jax.random.normal(k_obs, (batch, obs_dim), jnp.float32)
    action = jax.random.normal(k_act, (batch, action_dim), jnp.float32)
    params = init_params(k_par, obs_dim, action_dim, hidden_dim)

    q = jax.block_until_ready(qnetwork_forward(obs, action, params))
    q_ref = _reference_forward(obs, action, params)
    assert q.shape == (batch, 1)
    assert jnp.allclose(q, q_ref, atol=1e-5, rtol=1e-5)

    # ---- tiled config: exercises the batch grid and padding (1000 -> 1024) ----
    batch2, obs_dim2, act_dim2, hidden2 = 1000, 17, 6, 256
    k_o2, k_a2, k_p2 = jax.random.split(k_rest, 3)
    obs2 = jax.random.normal(k_o2, (batch2, obs_dim2), jnp.float32)
    act2 = jax.random.normal(k_a2, (batch2, act_dim2), jnp.float32)
    params2 = init_params(k_p2, obs_dim2, act_dim2, hidden2)

    q2 = jax.block_until_ready(
        qnetwork_forward(obs2, act2, params2, block_batch=512))
    q2_ref = _reference_forward(obs2, act2, params2)
    assert q2.shape == (batch2, 1)
    assert jnp.allclose(q2, q2_ref, atol=1e-4, rtol=1e-4)

    # bf16 MXU fast path (v6e/v7x): loose sanity check against the f32 reference.
    q2_bf16 = jax.block_until_ready(
        qnetwork_forward(obs2, act2, params2, block_batch=512,
                         compute_dtype=jnp.bfloat16))
    assert jnp.allclose(q2_bf16, q2_ref, atol=1e-1, rtol=1e-1)

    print("KERNEL_OK")
</pallas_src>

<mosaic_0001>
module attributes {stable_mosaic.version = 11 : i64} {
  func.func @_qnet_kernel(%arg0: i32, %arg1: memref<8x12xf32, #tpu.memory_space<vmem>>, %arg2: memref<8x4xf32, #tpu.memory_space<vmem>>, %arg3: memref<12x32xf32, #tpu.memory_space<vmem>>, %arg4: memref<4x32xf32, #tpu.memory_space<vmem>>, %arg5: memref<1x32xf32, #tpu.memory_space<vmem>>, %arg6: memref<32x32xf32, #tpu.memory_space<vmem>>, %arg7: memref<1x32xf32, #tpu.memory_space<vmem>>, %arg8: memref<1x32xf32, #tpu.memory_space<vmem>>, %arg9: memref<1x1xf32, #tpu.memory_space<vmem>>, %arg10: memref<8x1xf32, #tpu.memory_space<vmem>>) attributes {dimension_semantics = [#tpu.dimension_semantics<parallel>], iteration_bounds = array<i64: 1>, scalar_prefetch = 0 : i64, scratch_operands = 0 : i64, tpu.core_type = #tpu.core_type<tc>, window_params = [{transform_indices = @transform_0, window_bounds = array<i64: 8, 12>}, {transform_indices = @transform_1, window_bounds = array<i64: 8, 4>}, {pipeline_mode = #tpu.pipeline_mode<synchronous>, transform_indices = @transform_2, window_bounds = array<i64: 12, 32>}, {pipeline_mode = #tpu.pipeline_mode<synchronous>, transform_indices = @transform_3, window_bounds = array<i64: 4, 32>}, {pipeline_mode = #tpu.pipeline_mode<synchronous>, transform_indices = @transform_4, window_bounds = array<i64: 1, 32>}, {pipeline_mode = #tpu.pipeline_mode<synchronous>, transform_indices = @transform_5, window_bounds = array<i64: 32, 32>}, {pipeline_mode = #tpu.pipeline_mode<synchronous>, transform_indices = @transform_6, window_bounds = array<i64: 1, 32>}, {pipeline_mode = #tpu.pipeline_mode<synchronous>, transform_indices = @transform_7, window_bounds = array<i64: 1, 32>}, {pipeline_mode = #tpu.pipeline_mode<synchronous>, transform_indices = @transform_8, window_bounds = array<i64: 1, 1>}, {transform_indices = @transform_9, window_bounds = array<i64: 8, 1>}]} {
    %c0 = arith.constant 0 : index
    %c0_0 = arith.constant 0 : index
    %0 = vector.load %arg1[%c0, %c0_0] : memref<8x12xf32, #tpu.memory_space<vmem>>, vector<8x12xf32>
    %c0_1 = arith.constant 0 : index
    %c0_2 = arith.constant 0 : index
    %1 = vector.load %arg3[%c0_1, %c0_2] : memref<12x32xf32, #tpu.memory_space<vmem>>, vector<12x32xf32>
    %cst = arith.constant dense<0.000000e+00> : vector<8x32xf32>
    %2 = tpu.matmul %0, %1, %cst {dimension_numbers = #tpu.dot_dimension_numbers<[1], [0], [0], [1], [0, 0, 1, 1], [], []>} : vector<8x12xf32>, vector<12x32xf32>, vector<8x32xf32> -> vector<8x32xf32>
    %c0_3 = arith.constant 0 : index
    %c0_4 = arith.constant 0 : index
    %3 = vector.load %arg2[%c0_3, %c0_4] : memref<8x4xf32, #tpu.memory_space<vmem>>, vector<8x4xf32>
    %c0_5 = arith.constant 0 : index
    %c0_6 = arith.constant 0 : index
    %4 = vector.load %arg4[%c0_5, %c0_6] : memref<4x32xf32, #tpu.memory_space<vmem>>, vector<4x32xf32>
    %cst_7 = arith.constant dense<0.000000e+00> : vector<8x32xf32>
    %5 = tpu.matmul %3, %4, %cst_7 {dimension_numbers = #tpu.dot_dimension_numbers<[1], [0], [0], [1], [0, 0, 1, 1], [], []>} : vector<8x4xf32>, vector<4x32xf32>, vector<8x32xf32> -> vector<8x32xf32>
    %6 = arith.addf %2, %5 : vector<8x32xf32>
    %c0_8 = arith.constant 0 : index
    %c0_9 = arith.constant 0 : index
    %7 = vector.load %arg5[%c0_8, %c0_9] : memref<1x32xf32, #tpu.memory_space<vmem>>, vector<1x32xf32>
    %8 = vector.broadcast %7 : vector<1x32xf32> to vector<8x32xf32>
    %9 = arith.addf %6, %8 : vector<8x32xf32>
    %cst_10 = arith.constant 0.000000e+00 : f32
    %10 = vector.broadcast %cst_10 : f32 to vector<8x32xf32>
    %11 = arith.maximumf %9, %10 : vector<8x32xf32>
    %c0_11 = arith.constant 0 : index
    %c0_12 = arith.constant 0 : index
    %12 = vector.load %arg6[%c0_11, %c0_12] : memref<32x32xf32, #tpu.memory_space<vmem>>, vector<32x32xf32>
    %cst_13 = arith.constant dense<0.000000e+00> : vector<8x32xf32>
    %13 = tpu.matmul %11, %12, %cst_13 {dimension_numbers = #tpu.dot_dimension_numbers<[1], [0], [0], [1], [0, 0, 1, 1], [], []>} : vector<8x32xf32>, vector<32x32xf32>, vector<8x32xf32> -> vector<8x32xf32>
    %c0_14 = arith.constant 0 : index
    %c0_15 = arith.constant 0 : index
    %14 = vector.load %arg7[%c0_14, %c0_15] : memref<1x32xf32, #tpu.memory_space<vmem>>, vector<1x32xf32>
    %15 = vector.broadcast %14 : vector<1x32xf32> to vector<8x32xf32>
    %16 = arith.addf %13, %15 : vector<8x32xf32>
    %cst_16 = arith.constant 0.000000e+00 : f32
    %17 = vector.broadcast %cst_16 : f32 to vector<8x32xf32>
    %18 = arith.maximumf %16, %17 : vector<8x32xf32>
    %c0_17 = arith.constant 0 : index
    %c0_18 = arith.constant 0 : index
    %19 = vector.load %arg8[%c0_17, %c0_18] : memref<1x32xf32, #tpu.memory_space<vmem>>, vector<1x32xf32>
    %20 = vector.broadcast %19 : vector<1x32xf32> to vector<8x32xf32>
    %21 = arith.mulf %18, %20 : vector<8x32xf32>
    %cst_19 = arith.constant dense<0.000000e+00> : vector<8xf32>
    %22 = vector.multi_reduction <add>, %21, %cst_19 [1] : vector<8x32xf32> to vector<8xf32>
    %23 = vector.shape_cast %22 : vector<8xf32> to vector<8x1xf32>
    %c0_20 = arith.constant 0 : index
    %c0_21 = arith.constant 0 : index
    %24 = vector.load %arg9[%c0_20, %c0_21] : memref<1x1xf32, #tpu.memory_space<vmem>>, vector<1x1xf32>
    %25 = vector.broadcast %24 : vector<1x1xf32> to vector<8x1xf32>
    %26 = arith.addf %23, %25 : vector<8x1xf32>
    %c0_22 = arith.constant 0 : index
    %c0_23 = arith.constant 0 : index
    %27 = vector.load %arg10[%c0_22, %c0_23] : memref<8x1xf32, #tpu.memory_space<vmem>>, vector<8x1xf32>
    tpu.vector_store %arg10[%c0_22, %c0_23], %26 {strides = array<i32>} : memref<8x1xf32, #tpu.memory_space<vmem>>, vector<8x1xf32>,
    return
  }
  func.func @transform_0(%arg0: i32) -> (i32, i32) {
    %c0_i32 = arith.constant 0 : i32
    %c0_i32_0 = arith.constant 0 : i32
    return %arg0, %c0_i32 : i32, i32
  }
  func.func @transform_1(%arg0: i32) -> (i32, i32) {
    %c0_i32 = arith.constant 0 : i32
    %c0_i32_0 = arith.constant 0 : i32
    return %arg0, %c0_i32 : i32, i32
  }
  func.func @transform_2(%arg0: i32) -> (i32, i32) {
    %c0_i32 = arith.constant 0 : i32
    %c0_i32_0 = arith.constant 0 : i32
    %c0_i32_1 = arith.constant 0 : i32
    return %c0_i32, %c0_i32_0 : i32, i32
  }
  func.func @transform_3(%arg0: i32) -> (i32, i32) {
    %c0_i32 = arith.constant 0 : i32
    %c0_i32_0 = arith.constant 0 : i32
    %c0_i32_1 = arith.constant 0 : i32
    return %c0_i32, %c0_i32_0 : i32, i32
  }
  func.func @transform_4(%arg0: i32) -> (i32, i32) {
    %c0_i32 = arith.constant 0 : i32
    %c0_i32_0 = arith.constant 0 : i32
    %c0_i32_1 = arith.constant 0 : i32
    return %c0_i32, %c0_i32_0 : i32, i32
  }
  func.func @transform_5(%arg0: i32) -> (i32, i32) {
    %c0_i32 = arith.constant 0 : i32
    %c0_i32_0 = arith.constant 0 : i32
    %c0_i32_1 = arith.constant 0 : i32
    return %c0_i32, %c0_i32_0 : i32, i32
  }
  func.func @transform_6(%arg0: i32) -> (i32, i32) {
    %c0_i32 = arith.constant 0 : i32
    %c0_i32_0 = arith.constant 0 : i32
    %c0_i32_1 = arith.constant 0 : i32
    return %c0_i32, %c0_i32_0 : i32, i32
  }
  func.func @transform_7(%arg0: i32) -> (i32, i32) {
    %c0_i32 = arith.constant 0 : i32
    %c0_i32_0 = arith.constant 0 : i32
    %c0_i32_1 = arith.constant 0 : i32
    return %c0_i32, %c0_i32_0 : i32, i32
  }
  func.func @transform_8(%arg0: i32) -> (i32, i32) {
    %c0_i32 = arith.constant 0 : i32
    %c0_i32_0 = arith.constant 0 : i32
    %c0_i32_1 = arith.constant 0 : i32
    return %c0_i32, %c0_i32_0 : i32, i32
  }
  func.func @transform_9(%arg0: i32) -> (i32, i32) {
    %c0_i32 = arith.constant 0 : i32
    %c0_i32_0 = arith.constant 0 : i32
    return %arg0, %c0_i32 : i32, i32
  }
}

</mosaic_0001>

<bundles_post_ra>
// kernel: tpu_custom_call.1
= control target key start
LH: loop header
LB: loop body
LE: loop exit
PB: predicated region body
PF: predicated region fallthrough
CT: control target
= control target key end

     0   :  { %s556_s0 = inlined_call_operand.hbm [shape: f32[8,12], index: 0, kind: input, shape index: {}]   ;;  %s557_s1 = inlined_call_operand.vmem [shape: f32[8,4], index: 1, kind: input, shape index: {}]   ;;  %s558_s2 = inlined_call_operand.vmem [shape: f32[12,32], index: 2, kind: input, shape index: {}]   ;;  %s559_s3 = inlined_call_operand.hbm [shape: f32[4,32], index: 3, kind: input, shape index: {}]   ;;  %s560_s4 = inlined_call_operand.vmem [shape: f32[1,32], index: 4, kind: input, shape index: {}]   ;;  %s561_s5 = inlined_call_operand.hbm [shape: f32[32,32], index: 5, kind: input, shape index: {}]   ;;  %s562_s6 = inlined_call_operand.vmem [shape: f32[1,32], index: 6, kind: input, shape index: {}]   ;;  %s563_s7 = inlined_call_operand.vmem [shape: f32[1,32], index: 7, kind: input, shape index: {}]   ;;  %s564_s8 = inlined_call_operand.<no memory space> [shape: f32[1,1], index: 8, kind: input, shape index: {}]   ;;  %s565_s9 = inlined_call_operand.vmem [shape: f32[8,1], index: 9, kind: output, shape index: {}]  }
   0x1   :  { %v14_v0 = vstv %s564_s8 }
   0x2   :  { %15 = vst [vmem:[#allocation2] sm:$0x1] %v14_v0 }
   0x3   :  { %16 = vsyncpa [#allocation4], 0 }
   0x4   :  { %17 = vsyncpa [#allocation6], 0  ;;  %s466_s11 = smov [#allocation5]   ;;  %s467_s13 = smov [#allocation3]  }
   0x5   :  { %s38_s12 = sshll.u32 %s466_s11, 4  ;;  %s24_s14 = sshll.u32 %s467_s13, 4  ;;  %s39_s12 = int_to_ptr.vmem [resolvable:$true] %s38_s12  ;;  %s25_s14 = int_to_ptr.vmem [resolvable:$true] %s24_s14 }
   0x6   :  { %s410_s15 = scalar_lea.vmem %s39_s12, 64  ;;  %p415_p1 = scmp.lt.s32.totalorder %s39_s12, %s39_s12 }
   0x7   :  { %p411_p0 = scmp.ne.s32.totalorder %s39_s12, %s410_s15  ;;  %p416_p2 = scmp.lt.s32.totalorder %s410_s15, %s410_s15 }
   0x9   :  { %p417_p3 = por %p416_p2, %p415_p1 }
   0xb   :  { %p418_p4 = pnand %p417_p3, %p411_p0 }
   0xd   :  { %421 = shalt.err (!%p418_p4)
}
   0xe   :  { %41 = dma.hbm_to_vmem [thread:$0]  %s559_s3, 64, %s39_s12, [#allocation6]  }
   0xf   :  { %s430_s8 = scalar_lea.vmem %s25_s14, 128  ;;  %p435_p6 = scmp.lt.s32.totalorder %s25_s14, %s25_s14 }
  0x10   :  { %p431_p5 = scmp.ne.s32.totalorder %s25_s14, %s430_s8  ;;  %p436_p7 = scmp.lt.s32.totalorder %s430_s8, %s430_s8 }
  0x12   :  { %p437_p8 = por %p436_p7, %p435_p6 }
  0x14   :  { %p438_p9 = pnand %p437_p8, %p431_p5 }
  0x16   :  { %441 = shalt.err (!%p438_p9)
}
  0x17   :  { %27 = dma.hbm_to_vmem [thread:$0]  %s556_s0, 128, %s25_s14, [#allocation4]  }
  0x18   :  { %s468_s20 = smov [#allocation7]  }
  0x19   :  { %s49_s21 = sshll.u32 %s468_s20, 4  ;;  %s50_s21 = int_to_ptr.vmem [resolvable:$true] %s49_s21 }
  0x1a   :  { %s450_s22 = scalar_lea.vmem %s50_s21, 512  ;;  %p455_p11 = scmp.lt.s32.totalorder %s50_s21, %s50_s21 }
  0x1b   :  { %p451_p10 = scmp.ne.s32.totalorder %s50_s21, %s450_s22  ;;  %p456_p12 = scmp.lt.s32.totalorder %s450_s22, %s450_s22 }
  0x1d   :  { %p457_p13 = por %p456_p12, %p455_p11 }
  0x1f   :  { %p458_p0 = pnand %p457_p13, %p451_p10 }
  0x21   :  { %461 = shalt.err (!%p458_p0)
}
  0x22   :  { %s469_s3 = smov 128   ;;  %s470_s23 = smov 8  }
  0x23   :  { %55 = dma.hbm_to_vmem [thread:$0]  %s561_s5, 512, %s50_s21, [#allocation6], %s469_s3, %s469_s3, %s470_s23  }
  0x24   :  { %462 = dma.done.wait [#allocation4], 128  }
  0x25   :  { %463 = vsyncadd [#allocation4], 4294967168 }
  0x26   :  { %464 = dma.done.wait [#allocation6], 576  }
  0x27   :  { %465 = vsyncadd [#allocation6], 4294966720  ;;  %v471_v1 = vmov 0.0   ;;  %vm472_vm0 = vmmov 0   ;;  %vm80_vm1 = vcmask 1043456   ;;  %vm76_vm2 = vcmask 31744  }
  0x28   :  { %372 = vmatprep.subr.mxu1 %v471_v1  ;;  %374 = vmatprep.mubr.msk.f32.mxu1 %vm472_vm0, %v471_v1  ;;  %v75_v2 = vld [vmem:[#allocation5] sm:$0xf]  ;;  %v74_v3 = vld [vmem:[%s557_s1] sm:$0xff]  ;;  %vm154_vm3 = vcmask 97280   ;;  %v241_v9 = vld [vmem:[#allocation7 + $0x8] sm:$0xff]  ;;  %vm251_vm4 = vcmask 261120  }
  0x29   :  { %384 = vmatprep.subr.mxu0 %v471_v1  ;;  %392 = vmatprep.mubr.msk.f32.mxu0 %vm472_vm0, %v471_v1  ;;  %v73_v4 = vld [vmem:[%s558_s2 + $0x8] sm:$0xf]  ;;  %v72_v5 = vld [vmem:[%s558_s2] sm:$0xff]  ;;  %v240_v10 = vld [vmem:[#allocation7] sm:$0xff]  ;;  %vm345_vm5 = vcmask 7168  }
  0x2a   :  { %373 = vmatpush3.msk.msra.mxu1 %vm80_vm1, %v75_v2  ;;  %v71_v6 = vld [vmem:[#allocation3] sm:$0xff]  ;;  %v357_v14 = vld [vmem:[%s560_s4] ss:$0 sm:$0xff] }
  0x2b   :  { %375 = vmatmul.mubr.msk.f32.vlgmr.msra.gmra.mxu1 %vm76_vm2, %v74_v3  ;;  %377 = vmatprep.subr.mxu1 %v471_v1  ;;  %v243_v7 = vld [vmem:[#allocation7 + $0x18] sm:$0xff]  ;;  %v242_v8 = vld [vmem:[#allocation7 + $0x10] sm:$0xff] }
  0x2c   :  { %378 = vmatpush3.msk.msra.mxu1 %vm80_vm1, %v73_v4  ;;  %381 = vmatprep.mubr.msk.f32.mxu1 %vm472_vm0, %v471_v1  ;;  %v358_v19 = vld [vmem:[%s562_s6] ss:$0 sm:$0xff] }
  0x2d   :  { %379 = vmatprep.subr.mxu1 %v471_v1  ;;  %385 = vmatpush3.msra.mxu0 %v243_v7  ;;  %v360_v23 = vld [vmem:[%s563_s7] ss:$0 sm:$0xff] }
  0x2e   :  { %380 = vmatpush3.msra.mxu1 %v72_v5  ;;  %386 = vmatprep.subr.mxu0 %v471_v1  ;;  %v361_v27 = vld [vmem:[#allocation2] ss:$0 sm:$0xff] }
  0x2f   :  { %382 = vmatmul.mubr.msk.f32.vlgmr.msra.gmra.mxu1 %vm154_vm3, %v71_v6  ;;  %387 = vmatpush3.msra.mxu0 %v242_v8 }
  0x30   :  { %388 = vmatprep.subr.mxu0 %v471_v1 }
  0x31   :  { %389 = vmatpush3.msra.mxu0 %v241_v9 }
  0x32   :  { %390 = vmatprep.subr.mxu0 %v471_v1 }
  0x33   :  { %391 = vmatpush3.msra.mxu0 %v240_v10 }
  0xeb   :  { %v150_v11 = vpop.f32.mrf.mxu1 }
  0xed   :  { %v376_v12 = vpop.f32.mrf.mxu1 }
  0xef   :  { %v227_v13 = vpop.f32.mrf.mxu1 }
  0xf0   :  { %v228_v15 = vadd.f32 %v227_v13, %v150_v11 }
  0xf1   :  { %v383_v16 = vpop.f32.mrf.mxu1 }
  0xf2   :  { %v238_v17 = vadd.f32 %v357_v14, %v228_v15 }
  0xf4   :  { %v239_v18 = vmax.f32 %v238_v17, 0.0 }
  0xf6   :  { %393 = vmatmul.mubr.msk.f32.vlgmr.msra.gmra.mxu0 %vm251_vm4, %v239_v18 }
 0x1b6   :  { %v321_v20 = vpop.f32.mrf.mxu0 }
 0x1b7   :  { %v322_v21 = vadd.f32 %v358_v19, %v321_v20 }
 0x1b8   :  { %v394_v22 = vpop.f32.mrf.mxu0 }
 0x1b9   :  { %v325_v24 = vmax.f32 %v322_v21, 0.0 }
 0x1bb   :  { %v333_v25 = vmul.f32 %v360_v23, %v325_v24 }
 0x1bd   :  { %v334_v26 = vsel %vm251_vm4, %v333_v25, 0.0 }
 0x1be   :  { %335 = vadd.xlane.f32.xlu0 %v334_v26 }
 0x247   :  { %v336_v28 = vpop.xlane.xlu0 %335 }
 0x248   :  { %v344_v29 = vadd.f32 %v361_v27, %v336_v28 }
 0x24a   :  { %346 = vst.msk [vmem:[%s565_s9] sm:$0xff] %vm345_vm5, %v344_v29 }
 0x24b   :  { %351 = vsyncpa [#allocation4], 1 }
 0x24c   :  { %352 = vsyncpa [#allocation6], 1 }

</bundles_post_ra>
